<compile_context>
chip_gen: v7x
topology: tpu7x:2x2x1
jax: 0.10.0
libtpu: 0.0.40
codegen_flags: <defaults>
</compile_context>

<pallas_src>
import functools

import jax
import jax.numpy as jnp
from jax.experimental import pallas as pl
from jax.experimental.pallas import tpu as pltpu


def _round_up(x, m):
    return ((x + m - 1) // m) * m


def mnist_block_kernel(x_ref, scale_ref, shift_ref, mask_ref, w_ref, o_ref,
                       pad_ref, slab_ref, *, wp, l_out, cin):
    # x_ref:     (1, Cin, Lbuf)   one batch element, zero-padded flattened spatial (row stride wp)
    # scale_ref: (Cin, 1)         folded BN scale  = gamma / sqrt(var + eps)
    # shift_ref: (Cin, 1)         folded BN shift  = beta - mean * scale
    # mask_ref:  (1, Lbuf)        1.0 on interior pixels, 0.0 on the conv padding ring / tail
    # w_ref:     (Cout, 9*Cin)    conv weight, contraction index = (kh*3+kw)*Cin + cin
    # o_ref:     (1, Cout, Lout)  dense (stride-1) conv output over the flat padded grid
    # pad_ref:   VMEM (Cin, Lbuf) scratch: post-BN/ReLU activation with zero padding ring
    # slab_ref:  VMEM (9*Cin, Lout) scratch: im2col slab

    # BatchNorm (eval) + ReLU + zero the padding ring -- dense over 512 lanes.
    act = jnp.maximum(x_ref[0] * scale_ref[...] + shift_ref[...], 0.0)
    pad_ref[...] = act * mask_ref[...]

    # im2col: 9 static lane-shifted ref->ref copies onto the contraction (sublane) axis.
    for kh in range(3):
        for kw in range(3):
            tap = kh * 3 + kw
            slab_ref[pl.ds(tap * cin, cin), :] = (
                pad_ref[:, pl.ds(kh * wp + kw, l_out)])

    # Single fused MXU matmul: (Cout, 9*Cin) @ (9*Cin, Lout) -> (Cout, Lout), lane-dense store.
    o_ref[0] = jnp.dot(w_ref[...], slab_ref[...],
                       preferred_element_type=jnp.float32).astype(o_ref.dtype)


def mnist_block(x_nchw, gamma, beta, running_mean, running_var, w_oihw,
                *, stride=1, eps=1e-5):
    """Forward pass of MNISTBlock: conv1(relu(bn1(x))). Input/output NCHW."""
    N, Cin, H, W = x_nchw.shape
    Cout = w_oihw.shape[0]
    Hout = (H + 2 - 3) // stride + 1
    Wout = (W + 2 - 3) // stride + 1
    Hp, Wp = H + 2, W + 2

    # Lane-dense sizes (multiples of 128).
    l_out = _round_up(H * Wp, 128)                 # flat output positions computed in-kernel
    l_buf = _round_up(l_out + 2 * Wp + 2, 128)     # flat padded-activation length

    # ---- wrapper glue: layout plumbing + BN param folding (not the hot path) ----
    x_pad = jnp.pad(x_nchw.astype(jnp.float32), ((0, 0), (0, 0), (1, 1), (1, 1)))
    x_flat = x_pad.reshape(N, Cin, Hp * Wp)
    x_flat = jnp.pad(x_flat, ((0, 0), (0, 0), (0, l_buf - Hp * Wp)))

    inv_std = gamma / jnp.sqrt(running_var + eps)
    scale = inv_std.reshape(Cin, 1).astype(jnp.float32)
    shift = (beta - running_mean * inv_std).reshape(Cin, 1).astype(jnp.float32)

    q = jnp.arange(l_buf)
    col = q % Wp
    interior = (q >= Wp) & (q < Wp * (Hp - 1)) & (col != 0) & (col != Wp - 1)
    mask = interior.astype(jnp.float32).reshape(1, l_buf)

    # Weight: (Cout, Cin, 3, 3) -> (Cout, 3, 3, Cin) -> (Cout, 9*Cin); row order matches slab.
    w2d = jnp.transpose(w_oihw.astype(jnp.float32), (0, 2, 3, 1)).reshape(Cout, 9 * Cin)

    kernel = functools.partial(mnist_block_kernel, wp=Wp, l_out=l_out, cin=Cin)

    acc = pl.pallas_call(
        kernel,
        out_shape=jax.ShapeDtypeStruct((N, Cout, l_out), jnp.float32),
        grid_spec=pltpu.PrefetchScalarGridSpec(
            num_scalar_prefetch=0,
            grid=(N,),
            in_specs=[
                pl.BlockSpec((1, Cin, l_buf), lambda n: (n, 0, 0)),
                pl.BlockSpec((Cin, 1), lambda n: (0, 0)),
                pl.BlockSpec((Cin, 1), lambda n: (0, 0)),
                pl.BlockSpec((1, l_buf), lambda n: (0, 0)),
                pl.BlockSpec((Cout, 9 * Cin), lambda n: (0, 0)),
            ],
            out_specs=pl.BlockSpec((1, Cout, l_out), lambda n: (n, 0, 0)),
            scratch_shapes=[
                pltpu.VMEM((Cin, l_buf), jnp.float32),        # padded activation
                pltpu.VMEM((9 * Cin, l_out), jnp.float32),    # im2col slab
            ],
        ),
        compiler_params=pltpu.CompilerParams(dimension_semantics=("parallel",)),
    )(x_flat, scale, shift, mask, w2d)

    # Extract valid pixels (drop padding-ring columns, apply stride). Already NCHW.
    out = acc[:, :, :H * Wp].reshape(N, Cout, H, Wp)
    out = out[:, :, ::stride, ::stride][:, :, :Hout, :Wout]
    return out


def reference(x_nchw, gamma, beta, running_mean, running_var, w_oihw,
              *, stride=1, eps=1e-5):
    inv_std = gamma / jnp.sqrt(running_var + eps)
    scale = inv_std[None, :, None, None]
    shift = (beta - running_mean * inv_std)[None, :, None, None]
    a = jnp.maximum(x_nchw * scale + shift, 0.0)
    return jax.lax.conv_general_dilated(
        a, w_oihw, window_strides=(stride, stride), padding=((1, 1), (1, 1)),
        dimension_numbers=("NCHW", "OIHW", "NCHW"))


if __name__ == "__main__":
    key = jax.random.PRNGKey(0)
    k_x, k_w, k_g, k_b, k_m, k_v = jax.random.split(key, 6)

    N, in_planes, planes, H, W = 2, 4, 8, 16, 16

    x = jax.random.normal(k_x, (N, in_planes, H, W), jnp.float32)

    # Deterministic synthetic parameters (shapes per MNISTBlock.__init__).
    conv_w = 0.1 * jax.random.normal(k_w, (planes, in_planes, 3, 3), jnp.float32)
    gamma = 1.0 + 0.1 * jax.random.normal(k_g, (in_planes,), jnp.float32)
    beta = 0.1 * jax.random.normal(k_b, (in_planes,), jnp.float32)
    running_mean = 0.1 * jax.random.normal(k_m, (in_planes,), jnp.float32)
    running_var = 0.5 + jax.random.uniform(k_v, (in_planes,), jnp.float32)

    for stride in (1, 2):
        out = mnist_block(x, gamma, beta, running_mean, running_var, conv_w,
                          stride=stride)
        out = jax.block_until_ready(out)
        ref = reference(x, gamma, beta, running_mean, running_var, conv_w,
                        stride=stride)
        assert out.shape == ref.shape, (stride, out.shape, ref.shape)
        assert jnp.allclose(out, ref, atol=1e-4, rtol=1e-4), (
            stride, float(jnp.max(jnp.abs(out - ref))))

    print("KERNEL_OK")
</pallas_src>

<mosaic_0001>
module attributes {stable_mosaic.version = 11 : i64} {
  func.func @mnist_block_kernel(%arg0: i32, %arg1: memref<1x4x512xf32, #tpu.memory_space<vmem>>, %arg2: memref<4x1xf32, #tpu.memory_space<vmem>>, %arg3: memref<4x1xf32, #tpu.memory_space<vmem>>, %arg4: memref<1x512xf32, #tpu.memory_space<vmem>>, %arg5: memref<8x36xf32, #tpu.memory_space<vmem>>, %arg6: memref<1x8x384xf32, #tpu.memory_space<vmem>>, %arg7: memref<4x512xf32, #tpu.memory_space<vmem>>, %arg8: memref<36x384xf32, #tpu.memory_space<vmem>>) attributes {dimension_semantics = [#tpu.dimension_semantics<parallel>], iteration_bounds = array<i64: 2>, scalar_prefetch = 0 : i64, scratch_operands = 2 : i64, tpu.core_type = #tpu.core_type<tc>, window_params = [{transform_indices = @transform_0, window_bounds = array<i64: 1, 4, 512>}, {pipeline_mode = #tpu.pipeline_mode<synchronous>, transform_indices = @transform_1, window_bounds = array<i64: 4, 1>}, {pipeline_mode = #tpu.pipeline_mode<synchronous>, transform_indices = @transform_2, window_bounds = array<i64: 4, 1>}, {pipeline_mode = #tpu.pipeline_mode<synchronous>, transform_indices = @transform_3, window_bounds = array<i64: 1, 512>}, {pipeline_mode = #tpu.pipeline_mode<synchronous>, transform_indices = @transform_4, window_bounds = array<i64: 8, 36>}, {transform_indices = @transform_5, window_bounds = array<i64: 1, 8, 384>}]} {
    %c0 = arith.constant 0 : index
    %c0_0 = arith.constant 0 : index
    %c0_1 = arith.constant 0 : index
    %0 = vector.load %arg1[%c0, %c0_0, %c0_1] : memref<1x4x512xf32, #tpu.memory_space<vmem>>, vector<1x4x512xf32>
    %1 = vector.shape_cast %0 : vector<1x4x512xf32> to vector<4x512xf32>
    %c0_2 = arith.constant 0 : index
    %c0_3 = arith.constant 0 : index
    %2 = vector.load %arg2[%c0_2, %c0_3] : memref<4x1xf32, #tpu.memory_space<vmem>>, vector<4x1xf32>
    %3 = vector.broadcast %2 : vector<4x1xf32> to vector<4x512xf32>
    %4 = arith.mulf %1, %3 : vector<4x512xf32>
    %c0_4 = arith.constant 0 : index
    %c0_5 = arith.constant 0 : index
    %5 = vector.load %arg3[%c0_4, %c0_5] : memref<4x1xf32, #tpu.memory_space<vmem>>, vector<4x1xf32>
    %6 = vector.broadcast %5 : vector<4x1xf32> to vector<4x512xf32>
    %7 = arith.addf %4, %6 : vector<4x512xf32>
    %cst = arith.constant 0.000000e+00 : f32
    %8 = vector.broadcast %cst : f32 to vector<4x512xf32>
    %9 = arith.maximumf %7, %8 : vector<4x512xf32>
    %c0_6 = arith.constant 0 : index
    %c0_7 = arith.constant 0 : index
    %10 = vector.load %arg4[%c0_6, %c0_7] : memref<1x512xf32, #tpu.memory_space<vmem>>, vector<1x512xf32>
    %11 = vector.broadcast %10 : vector<1x512xf32> to vector<4x512xf32>
    %12 = arith.mulf %9, %11 : vector<4x512xf32>
    %c0_8 = arith.constant 0 : index
    %c0_9 = arith.constant 0 : index
    %13 = vector.load %arg7[%c0_8, %c0_9] : memref<4x512xf32, #tpu.memory_space<vmem>>, vector<4x512xf32>
    tpu.vector_store %arg7[%c0_8, %c0_9], %12 {strides = array<i32>} : memref<4x512xf32, #tpu.memory_space<vmem>>, vector<4x512xf32>,
    %c0_10 = arith.constant 0 : index
    %c0_11 = arith.constant 0 : index
    %14 = vector.load %arg7[%c0_10, %c0_11] : memref<4x512xf32, #tpu.memory_space<vmem>>, vector<4x384xf32>
    %c0_12 = arith.constant 0 : index
    %c0_13 = arith.constant 0 : index
    %15 = vector.load %arg8[%c0_12, %c0_13] : memref<36x384xf32, #tpu.memory_space<vmem>>, vector<4x384xf32>
    tpu.vector_store %arg8[%c0_12, %c0_13], %14 {strides = array<i32>} : memref<36x384xf32, #tpu.memory_space<vmem>>, vector<4x384xf32>,
    %c0_14 = arith.constant 0 : index
    %c1 = arith.constant 1 : index
    %16 = vector.load %arg7[%c0_14, %c1] : memref<4x512xf32, #tpu.memory_space<vmem>>, vector<4x384xf32>
    %c4 = arith.constant 4 : index
    %c0_15 = arith.constant 0 : index
    %17 = vector.load %arg8[%c4, %c0_15] : memref<36x384xf32, #tpu.memory_space<vmem>>, vector<4x384xf32>
    tpu.vector_store %arg8[%c4, %c0_15], %16 {strides = array<i32>} : memref<36x384xf32, #tpu.memory_space<vmem>>, vector<4x384xf32>,
    %c0_16 = arith.constant 0 : index
    %c2 = arith.constant 2 : index
    %18 = vector.load %arg7[%c0_16, %c2] : memref<4x512xf32, #tpu.memory_space<vmem>>, vector<4x384xf32>
    %c8 = arith.constant 8 : index
    %c0_17 = arith.constant 0 : index
    %19 = vector.load %arg8[%c8, %c0_17] : memref<36x384xf32, #tpu.memory_space<vmem>>, vector<4x384xf32>
    tpu.vector_store %arg8[%c8, %c0_17], %18 {strides = array<i32>} : memref<36x384xf32, #tpu.memory_space<vmem>>, vector<4x384xf32>,
    %c0_18 = arith.constant 0 : index
    %c18 = arith.constant 18 : index
    %20 = vector.load %arg7[%c0_18, %c18] : memref<4x512xf32, #tpu.memory_space<vmem>>, vector<4x384xf32>
    %c12 = arith.constant 12 : index
    %c0_19 = arith.constant 0 : index
    %21 = vector.load %arg8[%c12, %c0_19] : memref<36x384xf32, #tpu.memory_space<vmem>>, vector<4x384xf32>
    tpu.vector_store %arg8[%c12, %c0_19], %20 {strides = array<i32>} : memref<36x384xf32, #tpu.memory_space<vmem>>, vector<4x384xf32>,
    %c0_20 = arith.constant 0 : index
    %c19 = arith.constant 19 : index
    %22 = vector.load %arg7[%c0_20, %c19] : memref<4x512xf32, #tpu.memory_space<vmem>>, vector<4x384xf32>
    %c16 = arith.constant 16 : index
    %c0_21 = arith.constant 0 : index
    %23 = vector.load %arg8[%c16, %c0_21] : memref<36x384xf32, #tpu.memory_space<vmem>>, vector<4x384xf32>
    tpu.vector_store %arg8[%c16, %c0_21], %22 {strides = array<i32>} : memref<36x384xf32, #tpu.memory_space<vmem>>, vector<4x384xf32>,
    %c0_22 = arith.constant 0 : index
    %c20 = arith.constant 20 : index
    %24 = vector.load %arg7[%c0_22, %c20] : memref<4x512xf32, #tpu.memory_space<vmem>>, vector<4x384xf32>
    %c20_23 = arith.constant 20 : index
    %c0_24 = arith.constant 0 : index
    %25 = vector.load %arg8[%c20_23, %c0_24] : memref<36x384xf32, #tpu.memory_space<vmem>>, vector<4x384xf32>
    tpu.vector_store %arg8[%c20_23, %c0_24], %24 {strides = array<i32>} : memref<36x384xf32, #tpu.memory_space<vmem>>, vector<4x384xf32>,
    %c0_25 = arith.constant 0 : index
    %c36 = arith.constant 36 : index
    %26 = vector.load %arg7[%c0_25, %c36] : memref<4x512xf32, #tpu.memory_space<vmem>>, vector<4x384xf32>
    %c24 = arith.constant 24 : index
    %c0_26 = arith.constant 0 : index
    %27 = vector.load %arg8[%c24, %c0_26] : memref<36x384xf32, #tpu.memory_space<vmem>>, vector<4x384xf32>
    tpu.vector_store %arg8[%c24, %c0_26], %26 {strides = array<i32>} : memref<36x384xf32, #tpu.memory_space<vmem>>, vector<4x384xf32>,
    %c0_27 = arith.constant 0 : index
    %c37 = arith.constant 37 : index
    %28 = vector.load %arg7[%c0_27, %c37] : memref<4x512xf32, #tpu.memory_space<vmem>>, vector<4x384xf32>
    %c28 = arith.constant 28 : index
    %c0_28 = arith.constant 0 : index
    %29 = vector.load %arg8[%c28, %c0_28] : memref<36x384xf32, #tpu.memory_space<vmem>>, vector<4x384xf32>
    tpu.vector_store %arg8[%c28, %c0_28], %28 {strides = array<i32>} : memref<36x384xf32, #tpu.memory_space<vmem>>, vector<4x384xf32>,
    %c0_29 = arith.constant 0 : index
    %c38 = arith.constant 38 : index
    %30 = vector.load %arg7[%c0_29, %c38] : memref<4x512xf32, #tpu.memory_space<vmem>>, vector<4x384xf32>
    %c32 = arith.constant 32 : index
    %c0_30 = arith.constant 0 : index
    %31 = vector.load %arg8[%c32, %c0_30] : memref<36x384xf32, #tpu.memory_space<vmem>>, vector<4x384xf32>
    tpu.vector_store %arg8[%c32, %c0_30], %30 {strides = array<i32>} : memref<36x384xf32, #tpu.memory_space<vmem>>, vector<4x384xf32>,
    %c0_31 = arith.constant 0 : index
    %c0_32 = arith.constant 0 : index
    %32 = vector.load %arg5[%c0_31, %c0_32] : memref<8x36xf32, #tpu.memory_space<vmem>>, vector<8x36xf32>
    %c0_33 = arith.constant 0 : index
    %c0_34 = arith.constant 0 : index
    %33 = vector.load %arg8[%c0_33, %c0_34] : memref<36x384xf32, #tpu.memory_space<vmem>>, vector<36x384xf32>
    %cst_35 = arith.constant dense<0.000000e+00> : vector<8x384xf32>
    %34 = tpu.matmul %32, %33, %cst_35 {dimension_numbers = #tpu.dot_dimension_numbers<[1], [0], [0], [1], [0, 0, 1, 1], [], []>} : vector<8x36xf32>, vector<36x384xf32>, vector<8x384xf32> -> vector<8x384xf32>
    %c0_36 = arith.constant 0 : index
    %c0_37 = arith.constant 0 : index
    %c0_38 = arith.constant 0 : index
    %35 = vector.load %arg6[%c0_36, %c0_37, %c0_38] : memref<1x8x384xf32, #tpu.memory_space<vmem>>, vector<1x8x384xf32>
    %36 = vector.shape_cast %35 : vector<1x8x384xf32> to vector<8x384xf32>
    %37 = vector.shape_cast %34 : vector<8x384xf32> to vector<1x8x384xf32>
    tpu.vector_store %arg6[%c0_36, %c0_37, %c0_38], %37 {strides = array<i32>} : memref<1x8x384xf32, #tpu.memory_space<vmem>>, vector<1x8x384xf32>,
    return
  }
  func.func @transform_0(%arg0: i32) -> (i32, i32, i32) {
    %c0_i32 = arith.constant 0 : i32
    %c0_i32_0 = arith.constant 0 : i32
    %c0_i32_1 = arith.constant 0 : i32
    return %arg0, %c0_i32, %c0_i32_0 : i32, i32, i32
  }
  func.func @transform_1(%arg0: i32) -> (i32, i32) {
    %c0_i32 = arith.constant 0 : i32
    %c0_i32_0 = arith.constant 0 : i32
    %c0_i32_1 = arith.constant 0 : i32
    return %c0_i32, %c0_i32_0 : i32, i32
  }
  func.func @transform_2(%arg0: i32) -> (i32, i32) {
    %c0_i32 = arith.constant 0 : i32
    %c0_i32_0 = arith.constant 0 : i32
    %c0_i32_1 = arith.constant 0 : i32
    return %c0_i32, %c0_i32_0 : i32, i32
  }
  func.func @transform_3(%arg0: i32) -> (i32, i32) {
    %c0_i32 = arith.constant 0 : i32
    %c0_i32_0 = arith.constant 0 : i32
    %c0_i32_1 = arith.constant 0 : i32
    return %c0_i32, %c0_i32_0 : i32, i32
  }
  func.func @transform_4(%arg0: i32) -> (i32, i32) {
    %c0_i32 = arith.constant 0 : i32
    %c0_i32_0 = arith.constant 0 : i32
    %c0_i32_1 = arith.constant 0 : i32
    return %c0_i32, %c0_i32_0 : i32, i32
  }
  func.func @transform_5(%arg0: i32) -> (i32, i32, i32) {
    %c0_i32 = arith.constant 0 : i32
    %c0_i32_0 = arith.constant 0 : i32
    %c0_i32_1 = arith.constant 0 : i32
    return %arg0, %c0_i32, %c0_i32_0 : i32, i32, i32
  }
}

</mosaic_0001>

<bundles_post_ra>
// kernel: tpu_custom_call.1
= control target key start
LH: loop header
LB: loop body
LE: loop exit
PB: predicated region body
PF: predicated region fallthrough
CT: control target
= control target key end

     0   :  { %10 = vsyncpa [#allocation5], 0  ;;  %s1242_s0 = inlined_call_operand.hbm [shape: f32[2,4,512], index: 0, kind: input, shape index: {}]   ;;  %s1243_s1 = inlined_call_operand.vmem [shape: f32[4,1], index: 1, kind: input, shape index: {}]   ;;  %s1244_s2 = inlined_call_operand.vmem [shape: f32[4,1], index: 2, kind: input, shape index: {}]   ;;  %s1245_s3 = inlined_call_operand.vmem [shape: f32[1,512], index: 3, kind: input, shape index: {}]   ;;  %s1246_s4 = inlined_call_operand.vmem [shape: f32[8,36], index: 4, kind: input, shape index: {}]   ;;  %s1247_s5 = inlined_call_operand.hbm [shape: f32[2,8,384], index: 5, kind: output, shape index: {}]  }
   0x1   :  { %12 = vsyncpa [#allocation5 + $0x1], 0 }
   0x2   :  { %13 = vsyncpa [#allocation6], 0 }
   0x3   :  { %15 = vsyncpa [#allocation6 + $0x1], 0  ;;  %s1015_s18 = smov 0   ;;  %s1017_s19 = smov 0  }
   0x4   :  { %s1019_s20 = smov 0   ;;  %s1021_s21 = smov 0  }
   0x5 LB: > { %s1036_s22 = sadd.s32 4294967295, %s968_s21   ;;  %s760_s23 = sadd.s32 4294967294, %s968_s21   ;;  %s968_s21 = sphi %s1021_s21, %s1262_s21   ;;  %s964_s20 = sphi %s1019_s20, %s1261_s20   ;;  %s960_s19 = sphi %s1017_s19, %s1260_s19   ;;  %s956_s18 = sphi %s1015_s18, %s1259_s18  }
   0x6   : > { %s1040_s24 = sadd.s32 1, %s968_s21   ;;  %s28_s25 = sadd.s32 1, %s964_s20 }
   0x7   : > { %s25_s26 = ssub.s32 %s968_s21, %s1040_s24  ;;  %p35_p0 = scmp.ne.s32.totalorder %s964_s20, %s960_s19 }
   0x8   : > { %p26_p1 = scmp.eq.s32.totalorder %s25_s26, 0  ;;  %p36_p2 = scmp.eq.s32.totalorder %s968_s21, 0 }
   0x9   : > { %p41_p3 = scmp.ne.s32.totalorder %s960_s19, %s956_s18  ;;  %p42_p4 = scmp.eq.s32.totalorder %s1036_s22, 0 }
   0xa   : > { %s1052_s27 = scalar_select %p26_p1, %s964_s20, %s28_s25  }
   0xb   : > { %p1054_p5 = por %p36_p2, %p35_p0  ;;  %p1058_p6 = por %p42_p4, %p41_p3 }
   0xc   : > { %p149_p7 = scmp.eq.s32.totalorder %s1036_s22, 1  ;;  %p155_p8 = scmp.eq.s32.totalorder %s760_s23, 1 }
   0xd   : > { %p824_p10 = scmp.lt.s32.totalorder %s968_s21, 2  ;;  %s187_s7 = sand.u32 1, %s964_s20  }
   0xe   : > { %p1065_p11 = por %p149_p7, %p35_p0  ;;  %p1069_p12 = por %p155_p8, %p41_p3 }
   0xf   : > { %s776_s8 = sshll.u32 %s968_s21, 8  ;;  %s763_s9 = sshll.u32 %s187_s7, 4 }
  0x10   : > { %s1251_s30 = scalar_select %p1065_p11, 1, 0 }
  0x11   : > { %s1252_s6 = scalar_select %p1069_p12, 1, 0 }
  0x12   : > { %s1078_s12 = scalar_lea.hbm %s1242_s0, %s776_s8  ;;  %s191_s13 = scalar_lea.vmem [#allocation4], %s763_s9 }
  0x13   : > { %s199_s14 = sshll.u32 %s191_s13, 4  ;;  %p1082_p13 = pnand %p824_p10, %p1054_p5  ;;  %s1086_s14 = int_to_ptr.vmem [resolvable:$true] %s199_s14 }
  0x14   : > { %s188_s16 = scalar_lea.sflag [#allocation5], %s187_s7  ;;  %s872_s17 = scalar_lea.hbm %s1078_s12, 256 }
  0x15   : > { %p873_p2 = scmp.ne.s32.totalorder %s1078_s12, %s872_s17  ;;  %p874_p3 = pneg %p1082_p13 }
  0x16   : > { %s877_s26 = scalar_lea.hbm %s1242_s0, 512  ;;  %p878_p5 = scmp.lt.u32.totalorder %s1078_s12, %s1242_s0 }
  0x17   : > { %p875_p4 = pnand %p874_p3, %p873_p2  ;;  %p879_p8 = scmp.lt.u32.totalorder %s877_s26, %s872_s17 }
  0x18   : > { %p881_p9 = scmp.lt.u32.totalorder %s872_s17, %s1078_s12 }
  0x19   : > { %p876_p7 = pneg %p875_p4  ;;  %p880_p10 = por %p879_p8, %p878_p5 }
  0x1b   : > { %p882_p0 = por %p881_p9, %p880_p10 }
  0x1d   : > { %p883_p1 = pnand %p882_p0, %p876_p7 }
  0x1f   : > { %886 = shalt.err (!%p883_p1)
}
  0x20   : > { %s887_s7 = scalar_lea.vmem %s1086_s14, 256  ;;  %s970_s9 = smov [#allocation4]  }
  0x21   : > { %p888_p2 = scmp.ne.s32.totalorder %s1086_s14, %s887_s7  ;;  %s892_s10 = sshll.u32 %s970_s9, 4  ;;  %s893_s10 = int_to_ptr.vmem [resolvable:$false] %s892_s10 }
  0x22   : > { %s894_s11 = scalar_lea.vmem %s893_s10, 512  ;;  %p895_p11 = scmp.lt.s32.totalorder %s1086_s14, %s893_s10 }
  0x23   : > { %p890_p4 = pnand %p888_p2, %p874_p3  ;;  %p896_p5 = scmp.lt.s32.totalorder %s894_s11, %s887_s7 }
  0x25   : > { %p891_p12 = pneg %p890_p4  ;;  %p897_p8 = por %p896_p5, %p895_p11 }
  0x27   : > { %p898_p9 = pnand %p897_p8, %p891_p12 }
  0x29   : > { %901 = shalt.err (!%p898_p9)
}
  0x2a   : > { %819 = dma.hbm_to_vmem [thread:$0]  (!%p1082_p13), %s1078_s12, 256, %s1086_s14, %s188_s16  }
  0x2b   : > { %p1254_p0 = scmp.lt.s32.totalorder %s968_s21, 3  ;;  %p1255_p1 = scmp.ge.s32.totalorder %s968_s21, 1 }
  0x2d   : > { %p205_p3 = pnand %p1255_p1, %p1254_p0 }
  0x2e   : > { %s1120_s13 = sand.u32 (!%p205_p3), 1, %s960_s19  }
  0x2f   : > { %208 = sbr.rel (%p205_p3) target bundleno = 612 (0x264), region = 40  ;;  %s767_s17 = sshll.u32 (!%p205_p3), %s1120_s13, 4 }
  0x30   : > { %s211_s23 = scalar_lea.sflag (!%p205_p3), [#allocation5], %s1120_s13  ;;  %s214_s25 = scalar_lea.vmem (!%p205_p3), [#allocation4], %s767_s17 }
  0x36   : > { %947 = dma.done.wait (%p1058_p6), %s211_s23, 256  }
  0x37   : > { %949 = vsyncadd (%p1058_p6), %s211_s23, 4294967040  ;;  %v971_v0 = vmov 0   ;;  %v243_v1 = vld [vmem:[%s1243_s1] sm:$0xf]  ;;  %v972_v3 = vmov 839922192   ;;  %v251_v5 = vlaneseq }
  0x38   : > { %871 = vset.pattern.permute.xlu0 %v971_v0  ;;  %v258_v2 = vld [vmem:[%s1244_s2] sm:$0xf]  ;;  %v249_v4 = vunpack.c.l.s4 %v972_v3  ;;  %v241_v16 = vld [vmem:[%s214_s25] sm:$0xff]  ;;  %s973_s28 = smov 110   ;;  %s974_s8 = smov 127   ;;  %v980_v39 = vmov 0.0|0.0  }
  0x39   : > { %246 = vperm.xlu0 %871, %v243_v1   ;;  %v252_v7 = vshrl.u32 %v251_v5, 7  ;;  %v275_v14 = vld [vmem:[%s1245_s3] sm:$0xf]  ;;  %s975_s7 = smov 108   ;;  %s976_s9 = smov 126   ;;  %804 = vmatprep.subr.bf16.mxu1 %v980_v39  ;;  %v982_v40 = vmov 0.0  }
  0x3a   : > { %v250_v6 = vunpack.c.0.s8 %v249_v4  ;;  %v242_v17 = vld [vmem:[%s214_s25 + $0x8] sm:$0xff]  ;;  %s977_s10 = smov 91   ;;  %s978_s11 = smov 109   ;;  %595 = vmatprep.mubr.f32.mxu0 %v982_v40  ;;  %vm983_vm0 = vmmov 0   ;;  %vm347_vm1 = vcmask 1031168   ;;  %vm323_vm2 = vcmask 1039360  }
  0x3b   : > { %v279_v9 = vsub.s32 0, %v252_v7  ;;  %v283_v10 = vsub.s32 1, %v252_v7  ;;  %v287_v11 = vsub.s32 2, %v252_v7  ;;  %v291_v12 = vsub.s32 3, %v252_v7  ;;  %s979_s17 = smov 92   ;;  %s981_s23 = smov 90   ;;  %793 = vmatprep.mubr.msk.f32.mxu1 %vm983_vm0, %v982_v40 }
  0x3c   : > { %v253_v8 = vsub.s32 %v250_v6, %v252_v7  ;;  %vm371_vm3 = vcmask 900096   ;;  %vm395_vm4 = vcmask 891904   ;;  %vm443_vm5 = vcmask 752640   ;;  %s810_s14 = smul.u32 24, %s1120_s13  ;;  %p1256_p11 = scmp.ne.s32.totalorder %s1251_s30, 0 }
  0x3d   : > { %261 = vperm.xlu0 %871, %v258_v2   ;;  %v280_v18 = vrot.slane %v275_v14, %v279_v9  ;;  %v284_v19 = vrot.slane %v275_v14, %v283_v10  ;;  %v288_v20 = vrot.slane %v275_v14, %v287_v11  ;;  %v292_v21 = vrot.slane %v275_v14, %v291_v12  ;;  %s811_s29 = smul.u32 384, %s1036_s22  ;;  %s984_s22 = smov [#allocation7]  }
  0x3e   : > { %vm419_vm6 = vcmask 883712   ;;  %vm467_vm7 = vcmask 744448   ;;  %vm491_vm8 = vcmask 736256   ;;  %vm521_vm9 = vcmask 1043456   ;;  %s240_s15 = scalar_lea.vmem [#allocation7], %s810_s14 }
  0x3f   : > { %v293_v26 = vcombine.low %v280_v18, %v284_v19  ;;  %v294_v27 = vcombine.low %v288_v20, %v292_v21  ;;  %vm517_vm10 = vcmask 293888   ;;  %s690_s16 = sshll.u32 %s240_s15, 4  ;;  %s1195_s16 = int_to_ptr.vmem [resolvable:$true] %s690_s16 }
  0xb8   : > { %v247_v13 = vpop.permute.xlu0 %246 }
  0xb9   : > { %v254_v15 = vrot.slane %v247_v13, %v253_v8 }
  0xbb   : > { %v256_v23 = vmul.f32 %v254_v15, %v241_v16  ;;  %v257_v24 = vmul.f32 %v254_v15, %v242_v17 }
  0xbc   : > { %v262_v22 = vpop.permute.xlu0 %261 }
  0xbd   : > { %v269_v25 = vrot.slane %v262_v22, %v253_v8 }
  0xbf   : > { %v271_v28 = vadd.f32 %v269_v25, %v256_v23  ;;  %v272_v29 = vadd.f32 %v269_v25, %v257_v24 }
  0xc1   : > { %v273_v30 = vmax.f32 %v271_v28, 0.0  ;;  %v274_v31 = vmax.f32 %v272_v29, 0.0 }
  0xc3   : > { %v297_v32 = vmul.f32 %v293_v26, %v273_v30  ;;  %v298_v33 = vmul.f32 %v294_v27, %v274_v31 }
  0xc5   : > { %300 = vst [vmem:[#allocation2 + $0x8] sm:$0xff] %v298_v33  ;;  %365 = vrot.lane.b32.xlu0 %v297_v32, %s973_s28  ;;  %317 = vrot.lane.b32.xlu1 %v297_v32, %s974_s8  ;;  %v337_v34 = vcombine.high %v297_v32, %v297_v32  ;;  %306 = vst [vmem:[#allocation3] sm:$0xf] %v297_v32  ;;  %v361_v36 = vcombine.low %v297_v32, %v297_v32 }
  0xc6   : > { %v338_v37 = vcombine.high %v298_v33, %v298_v33  ;;  %v314_v38 = vcombine.low %v298_v33, %v298_v33 }
  0xc7   : > { %307 = vst [vmem:[#allocation3 + $0x8] sm:$0xf] %v337_v34 }
  0xc9   : > { %413 = vrot.lane.b32.xlu0 %v297_v32, %s975_s7  ;;  %343 = vrot.lane.b32.xlu1 %v298_v33, %s976_s9 }
  0xcc   : > { %v302_v35 = vld [vmem:[#allocation2 + $0x8] sm:$0xf] }
  0xcd   : > { %461 = vrot.lane.b32.xlu0 %v297_v32, %s977_s10  ;;  %339 = vrot.lane.b32.xlu1 %v297_v32, %s976_s9  ;;  %308 = vst [vmem:[#allocation3 + $0x10] sm:$0xf] %v302_v35 }
  0xd1   : > { %387 = vrot.lane.b32.xlu0 %v297_v32, %s978_s11  ;;  %321 = vrot.lane.b32.xlu1 %v298_v33, %s974_s8 }
  0xd5   : > { %435 = vrot.lane.b32.xlu0 %v297_v32, %s979_s17  ;;  %369 = vrot.lane.b32.xlu1 %v298_v33, %s973_s28 }
  0xd9   : > { %341 = vrot.lane.b32.xlu0 %v337_v34, %s976_s9  ;;  %391 = vrot.lane.b32.xlu1 %v298_v33, %s978_s11 }
  0xdd   : > { %439 = vrot.lane.b32.xlu1 %v298_v33, %s979_s17  ;;  %315 = vrot.lane.b32.xlu0 %v361_v36, %s974_s8 }
  0xe1   : > { %417 = vrot.lane.b32.xlu1 %v298_v33, %s975_s7  ;;  %363 = vrot.lane.b32.xlu0 %v361_v36, %s973_s28 }
  0xe5   : > { %465 = vrot.lane.b32.xlu1 %v298_v33, %s977_s10  ;;  %345 = vrot.lane.b32.xlu0 %v338_v37, %s976_s9  ;;  %s902_s9 = scalar_lea.vmem %s1195_s16, 384 }
  0xe6   : > { %p903_p6 = scmp.ne.s32.totalorder %s1195_s16, %s902_s9 }
  0xe8   : > { %p904_p12 = pnand %p903_p6, %p1256_p11 }
  0xe9   : > { %319 = vrot.lane.b32.xlu1 %v314_v38, %s974_s8  ;;  %389 = vrot.lane.b32.xlu0 %v337_v34, %s978_s11  ;;  %s1200_s8 = scalar_lea.hbm %s1247_s5, %s811_s29 }
  0xea   : > { %p905_p13 = pneg %p904_p12 }
  0xed   : > { %367 = vrot.lane.b32.xlu1 %v314_v38, %s973_s28  ;;  %437 = vrot.lane.b32.xlu0 %v337_v34, %s979_s17 }
  0xf1   : > { %415 = vrot.lane.b32.xlu1 %v314_v38, %s975_s7  ;;  %393 = vrot.lane.b32.xlu0 %v338_v37, %s978_s11 }
  0xf5   : > { %463 = vrot.lane.b32.xlu1 %v314_v38, %s977_s10  ;;  %441 = vrot.lane.b32.xlu0 %v338_v37, %s979_s17 }
  0xf9   : > { %411 = vrot.lane.b32.xlu1 %v361_v36, %s975_s7  ;;  %485 = vrot.lane.b32.xlu0 %v337_v34, %s981_s23  ;;  %s676_s7 = scalar_lea.sflag [#allocation6], %s1120_s13 }
  0xfd   : > { %459 = vrot.lane.b32.xlu1 %v361_v36, %s977_s10  ;;  %483 = vrot.lane.b32.xlu0 %v297_v32, %s981_s23  ;;  %s906_s10 = sshll.u32 %s984_s22, 4  ;;  %s907_s10 = int_to_ptr.vmem [resolvable:$false] %s906_s10 }
  0xfe   : > { %s908_s11 = scalar_lea.vmem %s907_s10, 768  ;;  %p909_p7 = scmp.lt.s32.totalorder %s1195_s16, %s907_s10 }
  0xff   : > { %p910_p10 = scmp.lt.s32.totalorder %s908_s11, %s902_s9 }
 0x101   : > { %487 = vrot.lane.b32.xlu1 %v298_v33, %s981_s23  ;;  %p911_p2 = por %p910_p10, %p909_p7 }
 0x103   : > { %p912_p4 = pnand %p911_p2, %p905_p13 }
 0x105   : > { %489 = vrot.lane.b32.xlu1 %v338_v37, %s981_s23 }
 0x137   : > { %v366_v41 = vpop.permute.xlu0 %365  ;;  %v318_v42 = vpop.permute.xlu1 %317 }
 0x13b   : > { %v1156_v43 = vpop.permute.xlu0 %413  ;;  %v344_v44 = vpop.permute.xlu1 %343 }
 0x13f   : > { %v1158_v45 = vpop.permute.xlu0 %461  ;;  %v340_v46 = vpop.permute.xlu1 %339 }
 0x143   : > { %v388_v47 = vpop.permute.xlu0 %387  ;;  %v322_v48 = vpop.permute.xlu1 %321 }
 0x147   : > { %v436_v49 = vpop.permute.xlu0 %435  ;;  %v370_v50 = vpop.permute.xlu1 %369 }
 0x14b   : > { %v342_v51 = vpop.permute.xlu0 %341  ;;  %v392_v52 = vpop.permute.xlu1 %391 }
 0x14c   : > { %v348_v53 = vsel %vm347_vm1, %v340_v46, %v342_v51  ;;  %v349_v54 = vsel %vm347_vm1, %v342_v51, %v344_v44 }
 0x14d   : > { %354 = vst [vmem:[#allocation3 + $0x18] sm:$0xf] %v348_v53  ;;  %355 = vst [vmem:[#allocation3 + $0x20] sm:$0xf] %v349_v54  ;;  %v501_v53 = vld [vmem:[%s1246_s4] sm:$0xff] }
 0x14f   : > { %v440_v55 = vpop.permute.xlu1 %439  ;;  %v316_v56 = vpop.permute.xlu0 %315 }
 0x150   : > { %v324_v57 = vsel %vm323_vm2, %v316_v56, %v318_v42 }
 0x151   : > { %330 = vst [vmem:[#allocation3] sm:$0xf0] %v324_v57 }
 0x153   : > { %v418_v58 = vpop.permute.xlu1 %417  ;;  %v364_v59 = vpop.permute.xlu0 %363 }
 0x154   : > { %v372_v60 = vsel %vm371_vm3, %v364_v59, %v366_v41 }
 0x155   : > { %378 = vst [vmem:[#allocation3 + $0x18] sm:$0xf0] %v372_v60 }
 0x157   : > { %v466_v61 = vpop.permute.xlu1 %465  ;;  %v346_v62 = vpop.permute.xlu0 %345 }
 0x158   : > { %v350_v63 = vsel %vm347_vm1, %v344_v44, %v346_v62  ;;  %v502_v29 = vld [vmem:[#allocation3] sm:$0xff] }
 0x159   : > { %356 = vst [vmem:[#allocation3 + $0x28] sm:$0xf] %v350_v63 }
 0x15b   : > { %v320_v0 = vpop.permute.xlu1 %319  ;;  %v390_v1 = vpop.permute.xlu0 %389 }
 0x15c   : > { %v325_v2 = vsel %vm323_vm2, %v318_v42, %v320_v0  ;;  %v326_v3 = vsel %vm323_vm2, %v320_v0, %v322_v48  ;;  %v396_v4 = vsel %vm395_vm4, %v388_v47, %v390_v1  ;;  %v397_v5 = vsel %vm395_vm4, %v390_v1, %v392_v52  ;;  %v505_v20 = vld [vmem:[#allocation3 + $0x18] sm:$0xff] }
 0x15d   : > { %331 = vst [vmem:[#allocation3 + $0x8] sm:$0xf0] %v325_v2  ;;  %332 = vst [vmem:[#allocation3 + $0x10] sm:$0xf0] %v326_v3  ;;  %v798_v30 = vpack.c.bf16 %v505_v20, %v502_v29 }
 0x15e   : > { %402 = vst [vmem:[#allocation3 + $0x30] sm:$0xf] %v396_v4  ;;  %403 = vst [vmem:[#allocation3 + $0x38] sm:$0xf] %v397_v5 }
 0x15f   : > { %v368_v6 = vpop.permute.xlu1 %367  ;;  %v438_v7 = vpop.permute.xlu0 %437 }
 0x160   : > { %v373_v8 = vsel %vm371_vm3, %v366_v41, %v368_v6  ;;  %v374_v9 = vsel %vm371_vm3, %v368_v6, %v370_v50  ;;  %v444_v10 = vsel %vm443_vm5, %v436_v49, %v438_v7  ;;  %v445_v11 = vsel %vm443_vm5, %v438_v7, %v440_v55 }
 0x161   : > { %379 = vst [vmem:[#allocation3 + $0x20] sm:$0xf0] %v373_v8  ;;  %380 = vst [vmem:[#allocation3 + $0x28] sm:$0xf0] %v374_v9 }
 0x162   : > { %450 = vst [vmem:[#allocation3 + $0x48] sm:$0xf] %v444_v10  ;;  %451 = vst [vmem:[#allocation3 + $0x50] sm:$0xf] %v445_v11 }
 0x163   : > { %v416_v12 = vpop.permute.xlu1 %415  ;;  %v394_v13 = vpop.permute.xlu0 %393 }
 0x164   : > { %v421_v14 = vsel %vm419_vm6, %v1156_v43, %v416_v12  ;;  %v422_v15 = vsel %vm419_vm6, %v416_v12, %v418_v58  ;;  %v398_v16 = vsel %vm395_vm4, %v392_v52, %v394_v13  ;;  %v504_v19 = vld [vmem:[#allocation3 + $0x10] sm:$0xff]  ;;  %v503_v25 = vld [vmem:[#allocation3 + $0x8] sm:$0xff] }
 0x165   : > { %427 = vst [vmem:[#allocation3 + $0x38] sm:$0xf0] %v421_v14  ;;  %428 = vst [vmem:[#allocation3 + $0x40] sm:$0xf0] %v422_v15 }
 0x166   : > { %404 = vst [vmem:[#allocation3 + $0x40] sm:$0xf] %v398_v16 }
 0x167   : > { %v464_v17 = vpop.permute.xlu1 %463  ;;  %v442_v18 = vpop.permute.xlu0 %441 }
 0x168   : > { %v469_v21 = vsel %vm467_vm7, %v1158_v45, %v464_v17  ;;  %v470_v22 = vsel %vm467_vm7, %v464_v17, %v466_v61  ;;  %v446_v23 = vsel %vm443_vm5, %v440_v55, %v442_v18  ;;  %v507_v24 = vld [vmem:[#allocation3 + $0x28] sm:$0xff]  ;;  %v506_v26 = vld [vmem:[#allocation3 + $0x20] sm:$0xff] }
 0x169   : > { %475 = vst [vmem:[#allocation3 + $0x50] sm:$0xf0] %v469_v21  ;;  %476 = vst [vmem:[#allocation3 + $0x58] sm:$0xf0] %v470_v22  ;;  %v805_v27 = vpack.c.bf16 %v507_v24, %v504_v19  ;;  %v796_v28 = vpack.c.bf16 %v506_v26, %v503_v25 }
 0x16a   : > { %452 = vst [vmem:[#allocation3 + $0x58] sm:$0xf] %v446_v23 }
 0x16b   : > { %v412_v31 = vpop.permute.xlu1 %411  ;;  %806 = vmatpush3.bf16.msra.mxu1 %v805_v27  ;;  %v486_v32 = vpop.permute.xlu0 %485  ;;  %797 = vmatprep.subr.bf16.mxu0 %v796_v28 }
 0x16c   : > { %v420_v33 = vsel %vm419_vm6, %v412_v31, %v1156_v43  ;;  %799 = vmatpush1.bf16.msra.mxu0 %v798_v30  ;;  %807 = vmatprep.subr.bf16.mxu1 %v980_v39  ;;  %v509_v36 = vld [vmem:[#allocation3 + $0x38] sm:$0xff] }
 0x16d   : > { %426 = vst [vmem:[#allocation3 + $0x30] sm:$0xf0] %v420_v33  ;;  %v510_v42 = vld [vmem:[#allocation3 + $0x40] sm:$0xff] }
 0x16f   : > { %v460_v34 = vpop.permute.xlu1 %459  ;;  %v484_v35 = vpop.permute.xlu0 %483 }
 0x170   : > { %v468_v37 = vsel %vm467_vm7, %v460_v34, %v1158_v45  ;;  %v492_v38 = vsel %vm491_vm8, %v484_v35, %v486_v32  ;;  %v512_v41 = vld [vmem:[#allocation3 + $0x50] sm:$0xff] }
 0x171   : > { %v513_v44 = vld [vmem:[#allocation3 + $0x58] sm:$0xff]  ;;  %474 = vst [vmem:[#allocation3 + $0x48] sm:$0xf0] %v468_v37  ;;  %498 = vst [vmem:[#allocation3 + $0x60] sm:$0xf] %v492_v38  ;;  %v800_v46 = vpack.c.bf16 %v512_v41, %v509_v36 }
 0x172   : > { %v808_v43 = vpack.c.bf16 %v513_v44, %v510_v42 }
 0x173   : > { %v488_v47 = vpop.permute.xlu1 %487  ;;  %801 = vmatprep.subr.bf16.mxu0 %v800_v46 }
 0x174   : > { %809 = vmatpush3.bf16.msra.mxu1 %v808_v43  ;;  %v493_v39 = vsel %vm491_vm8, %v486_v32, %v488_v47  ;;  %v508_v49 = vld [vmem:[#allocation3 + $0x30] sm:$0xff] }
 0x175   : > { %791 = vmatprep.subr.mxu1 %v982_v40  ;;  %499 = vst [vmem:[#allocation3 + $0x68] sm:$0xf] %v493_v39 }
 0x177   : > { %v490_v48 = vpop.permute.xlu1 %489 }
 0x178   : > { %v494_v45 = vsel %vm491_vm8, %v488_v47, %v490_v48  ;;  %v511_v50 = vld [vmem:[#allocation3 + $0x48] sm:$0xff]  ;;  %v514_v40 = vld [vmem:[#allocation3 + $0x60] sm:$0xf] }
 0x179   : > { %500 = vst [vmem:[#allocation3 + $0x70] sm:$0xf] %v494_v45  ;;  %v802_v51 = vpack.c.bf16 %v511_v50, %v508_v49 }
 0x17b   : > { %803 = vmatpush1.bf16.msra.mxu0 %v802_v51 }
 0x17c   : > { %v515_v52 = vld [vmem:[#allocation3 + $0x68] sm:$0xf] }
 0x17d   : > { %768 = vmatprep.subr.msk.mxu0 %vm521_vm9, %v515_v52 }
 0x17f   : > { %769 = vmatpush1.msk.msra.mxu0 %vm521_vm9, %v514_v40 }
 0x180   : > { %770 = vmatmul.mubr.msk.f32.vlgmr.msra.gmra.mrb[0].mxu0 %vm517_vm10, %v501_v53  ;;  %v516_v54 = vld [vmem:[#allocation3 + $0x70] sm:$0xf] }
 0x181   : > { %792 = vmatpush3.msk.msra.mxu1 %vm521_vm9, %v516_v54 }
 0x182   : > { %794 = vmatmul.mubr.msk.f32.vlgmr.msra.gmra.mrb[0].mxu1 %vm517_vm10, %v501_v53 }
 0x253   : > { %v597_v55 = vpop.f32.mrb[0].mxu0 }
 0x254   : > { %672 = vst [vmem:[%s240_s15] sm:$0xff] %v597_v55  ;;  %v599_v56 = vpop.f32.mrb[1].mxu0 }
 0x255   : > { %673 = vst [vmem:[%s240_s15 + $0x8] sm:$0xff] %v599_v56  ;;  %v668_v57 = vpop.f32.mrb[0].mxu1 }
 0x256   : > { %674 = vst [vmem:[%s240_s15 + $0x10] sm:$0xff] %v668_v57  ;;  %v795_v58 = vpop.f32.mrb[1].mxu1 }
 0x257   : > { %915 = shalt.err (!%p912_p4)
}
 0x258   : > { %s916_s13 = scalar_lea.hbm %s1200_s8, 384  ;;  %s920_s25 = scalar_lea.hbm %s1247_s5, 768 }
 0x259   : > { %p917_p5 = scmp.ne.s32.totalorder %s1200_s8, %s916_s13  ;;  %p921_p0 = scmp.lt.u32.totalorder %s1200_s8, %s1247_s5 }
 0x25a   : > { %p922_p1 = scmp.lt.u32.totalorder %s920_s25, %s916_s13  ;;  %p924_p6 = scmp.lt.u32.totalorder %s916_s13, %s1200_s8 }
 0x25b   : > { %p918_p8 = pnand %p917_p5, %p1256_p11 }
 0x25c   : > { %p923_p3 = por %p922_p1, %p921_p0 }
 0x25d   : > { %p919_p9 = pneg %p918_p8 }
 0x25e   : > { %p925_p12 = por %p924_p6, %p923_p3 }
 0x260   : > { %p926_p13 = pnand %p925_p12, %p919_p9 }
 0x262   : > { %929 = shalt.err (!%p926_p13)
}
 0x263   : > { %814 = dma.vmem_to_hbm [thread:$0]  (%p1256_p11), %s1195_s16, 384, %s1200_s8, %s676_s7  }
 0x264 PF: > { %s702_s15 = sand.u32 1, %s956_s18   ;;  %p1257_p7 = scmp.ne.s32.totalorder %s1252_s6, 0 }
 0x265   : > { %p1258_p10 = scmp.ge.s32.totalorder %s968_s21, 2  ;;  %s703_s29 = scalar_lea.sflag [#allocation6], %s702_s15 }
 0x267   : > { %p821_p2 = pnand %p1258_p10, %p1257_p7 }
 0x269   : > { %951 = dma.done.wait (!%p821_p2), %s703_s29, 384  }
 0x26a   : > { %953 = vsyncadd (!%p821_p2), %s703_s29, 4294966912  ;;  %p18_p4 = scmp.ge.s32.totalorder %s1040_s24, 4   ;;  %s1259_s18 = smov %s960_s19 }
 0x26b   : > { %s1260_s19 = smov %s964_s20  ;;  %s1261_s20 = smov %s1052_s27 }
 0x26c   : > { %s1262_s21 = smov %s1040_s24  ;;  %20 = sbr.rel (!%p18_p4) target bundleno = 5 (0x5), region = 85 }
 0x273   :  { %708 = vsyncpa [#allocation5], 1 }
 0x274   :  { %710 = vsyncpa [#allocation5 + $0x1], 1 }
 0x275   :  { %711 = vsyncpa [#allocation6], 1 }
 0x276   :  { %713 = vsyncpa [#allocation6 + $0x1], 1 }

</bundles_post_ra>
